<compile_context>
chip_gen: v6e
topology: v6e:2x2x1
jax: 0.10.0
libtpu: 0.0.40
codegen_flags: <defaults>
</compile_context>

<pallas_src>
import jax
import jax.numpy as jnp
import numpy as np
from jax.experimental import pallas as pl
from jax.experimental.pallas import tpu as pltpu


def _round_up(x, m):
    return ((x + m - 1) // m) * m


def make_dqn_kernel(in_dim, compute_dtype):
    """Kernel factory. `compute_dtype` is the MXU input dtype (f32 or bf16)
    for layers 2/3; accumulation, bias adds and ReLU are always f32."""

    def dqn_kernel(x_ref, w1_ref, b1_ref, w2_ref, b2_ref, w3_ref, b3_ref, o_ref):
        x = x_ref[...].astype(jnp.float32)          # (tb, in_dim) f32
        w1 = w1_ref[...].astype(jnp.float32)        # (in_dim, H1) f32

        # ---- Layer 1: Linear(in_dim, H1) + ReLU ----
        if in_dim <= 8:
            # K=in_dim is far too shallow for the MXU contraction dim; do it on
            # the VPU as `in_dim` broadcast multiply-adds of w1's rows.
            h1 = b1_ref[...]                        # (1, H1), broadcasts up
            for k in range(in_dim):
                h1 = h1 + x[:, k:k + 1] * w1[k:k + 1, :]
        else:
            h1 = jnp.dot(x.astype(compute_dtype), w1.astype(compute_dtype),
                         preferred_element_type=jnp.float32) + b1_ref[...]
        h1 = jnp.maximum(h1, 0.0)

        # ---- Layer 2: Linear(H1, H2) + ReLU (MXU) ----
        h2 = jnp.dot(h1.astype(compute_dtype), w2_ref[...],
                     preferred_element_type=jnp.float32)
        h2 = jnp.maximum(h2 + b2_ref[...], 0.0)

        # ---- Layer 3: Linear(H2, out_dim), narrow output, no activation ----
        o = jnp.dot(h2.astype(compute_dtype), w3_ref[...],
                    preferred_element_type=jnp.float32)
        o_ref[...] = (o + b3_ref[...]).astype(o_ref.dtype)

    return dqn_kernel


def dqn_forward(x, params, *, block_b=1024, use_bf16=True, out_dtype=jnp.float32):
    """x: [B, input_dim] f32; params: dict of w1,b1,w2,b2,w3,b3
    (w: [in, out], b: [1, out]).  Returns [B, out_dim] of `out_dtype`."""
    B, in_dim = x.shape
    H1 = params["w1"].shape[1]
    H2 = params["w2"].shape[1]
    out_dim = params["w3"].shape[1]

    compute_dtype = jnp.bfloat16 if use_bf16 else jnp.float32

    # Tiny resident weights may be cast wrapper-side; x stays f32 in HBM.
    w1, b1 = params["w1"], params["b1"]
    w2 = params["w2"].astype(compute_dtype)
    w3 = params["w3"].astype(compute_dtype)
    b2, b3 = params["b2"], params["b3"]          # biases stay f32

    # Batch tile: sublane-aligned; no wrapper padding — Pallas masks the
    # ragged final block.
    sub = 16 if jnp.dtype(out_dtype) == jnp.dtype(jnp.bfloat16) else 8
    tb = max(sub, min(_round_up(block_b, sub), _round_up(B, sub)))
    grid_n = pl.cdiv(B, tb)

    out_bytes = jnp.dtype(out_dtype).itemsize
    w_bytes = 4 * (in_dim * H1 + H1 + H1 * H2 + H2 + H2 * out_dim + out_dim)
    cost = pl.CostEstimate(
        flops=2 * B * (in_dim * H1 + H1 * H2 + H2 * out_dim),
        transcendentals=0,
        bytes_accessed=B * (in_dim * 4 + out_dim * out_bytes) + w_bytes,
    )

    out = pl.pallas_call(
        make_dqn_kernel(in_dim, compute_dtype),
        out_shape=jax.ShapeDtypeStruct((B, out_dim), out_dtype),
        grid=(grid_n,),
        in_specs=[
            pl.BlockSpec((tb, in_dim), lambda i: (i, 0)),     # x tile (f32)
            pl.BlockSpec((in_dim, H1), lambda i: (0, 0)),     # w1 (resident)
            pl.BlockSpec((1, H1), lambda i: (0, 0)),          # b1 (resident)
            pl.BlockSpec((H1, H2), lambda i: (0, 0)),         # w2 (resident)
            pl.BlockSpec((1, H2), lambda i: (0, 0)),          # b2 (resident)
            pl.BlockSpec((H2, out_dim), lambda i: (0, 0)),    # w3 (resident)
            pl.BlockSpec((1, out_dim), lambda i: (0, 0)),     # b3 (resident)
        ],
        out_specs=pl.BlockSpec((tb, out_dim), lambda i: (i, 0)),
        compiler_params=pltpu.CompilerParams(
            dimension_semantics=("parallel",)),               # megacore shard on v7x
        cost_estimate=cost,
    )(x, w1, b1, w2, b2, w3, b3)

    return out


def init_params(key, input_dim=3, hidden=64, output_dim=4):
    """Deterministic init mimicking PyTorch's default Linear init
    (uniform(-1/sqrt(fan_in), 1/sqrt(fan_in))). Weights stored [in, out]."""
    dims = [(input_dim, hidden), (hidden, hidden), (hidden, output_dim)]
    params = {}
    for i, (fan_in, fan_out) in enumerate(dims, start=1):
        key, kw, kb = jax.random.split(key, 3)
        bound = 1.0 / np.sqrt(fan_in)
        params[f"w{i}"] = jax.random.uniform(
            kw, (fan_in, fan_out), jnp.float32, minval=-bound, maxval=bound)
        params[f"b{i}"] = jax.random.uniform(
            kb, (1, fan_out), jnp.float32, minval=-bound, maxval=bound)
    return params


def dqn_reference(x, p):
    h1 = jnp.maximum(x @ p["w1"] + p["b1"], 0.0)
    h2 = jnp.maximum(h1 @ p["w2"] + p["b2"], 0.0)
    return h2 @ p["w3"] + p["b3"]


if __name__ == "__main__":
    key = jax.random.PRNGKey(0)
    key, kx1, kx2 = jax.random.split(key, 3)

    input_dim, output_dim = 3, 4
    params = init_params(key, input_dim=input_dim, hidden=64, output_dim=output_dim)

    # --- small acting-step batch, strict f32 path ---
    x_small = jax.random.normal(kx1, (8, input_dim), jnp.float32)
    ref = dqn_reference(x_small, params)
    out_f32 = jax.block_until_ready(dqn_forward(x_small, params, use_bf16=False))
    np.testing.assert_allclose(np.asarray(out_f32), np.asarray(ref),
                               rtol=1e-5, atol=1e-5)
    assert out_f32.shape == (8, output_dim)

    # --- small batch, default training path (bf16 MXU inputs, f32 accumulate) ---
    out_bf16 = jax.block_until_ready(dqn_forward(x_small, params))
    np.testing.assert_allclose(np.asarray(out_bf16), np.asarray(ref),
                               rtol=5e-2, atol=5e-2)

    # --- multi-tile grid with a ragged final block (no wrapper pad/slice) ---
    x_big = jax.random.normal(kx2, (250, input_dim), jnp.float32)
    ref_big = dqn_reference(x_big, params)
    out_big = jax.block_until_ready(dqn_forward(x_big, params, block_b=64))
    np.testing.assert_allclose(np.asarray(out_big), np.asarray(ref_big),
                               rtol=5e-2, atol=5e-2)
    assert out_big.shape == (250, output_dim)

    # --- bf16 output writeback variant ---
    x_256 = x_big[:240]
    out_bf16o = jax.block_until_ready(
        dqn_forward(x_256, params, block_b=64, out_dtype=jnp.bfloat16))
    np.testing.assert_allclose(np.asarray(out_bf16o, dtype=np.float32),
                               np.asarray(ref_big[:240]), rtol=5e-2, atol=5e-2)
    assert out_bf16o.dtype == jnp.bfloat16 and out_bf16o.shape == (240, output_dim)

    print("KERNEL_OK")
</pallas_src>

<mosaic_0001>
module attributes {stable_mosaic.version = 11 : i64} {
  func.func @dqn_kernel(%arg0: i32, %arg1: memref<8x3xf32, #tpu.memory_space<vmem>>, %arg2: memref<3x64xf32, #tpu.memory_space<vmem>>, %arg3: memref<1x64xf32, #tpu.memory_space<vmem>>, %arg4: memref<64x64xf32, #tpu.memory_space<vmem>>, %arg5: memref<1x64xf32, #tpu.memory_space<vmem>>, %arg6: memref<64x4xf32, #tpu.memory_space<vmem>>, %arg7: memref<1x4xf32, #tpu.memory_space<vmem>>, %arg8: memref<8x4xf32, #tpu.memory_space<vmem>>) attributes {dimension_semantics = [#tpu.dimension_semantics<parallel>], iteration_bounds = array<i64: 1>, scalar_prefetch = 0 : i64, scratch_operands = 0 : i64, tpu.core_type = #tpu.core_type<tc>, window_params = [{transform_indices = @transform_0, window_bounds = array<i64: 8, 3>}, {pipeline_mode = #tpu.pipeline_mode<synchronous>, transform_indices = @transform_1, window_bounds = array<i64: 3, 64>}, {pipeline_mode = #tpu.pipeline_mode<synchronous>, transform_indices = @transform_2, window_bounds = array<i64: 1, 64>}, {pipeline_mode = #tpu.pipeline_mode<synchronous>, transform_indices = @transform_3, window_bounds = array<i64: 64, 64>}, {pipeline_mode = #tpu.pipeline_mode<synchronous>, transform_indices = @transform_4, window_bounds = array<i64: 1, 64>}, {pipeline_mode = #tpu.pipeline_mode<synchronous>, transform_indices = @transform_5, window_bounds = array<i64: 64, 4>}, {pipeline_mode = #tpu.pipeline_mode<synchronous>, transform_indices = @transform_6, window_bounds = array<i64: 1, 4>}, {transform_indices = @transform_7, window_bounds = array<i64: 8, 4>}]} {
    %c0 = arith.constant 0 : index
    %c0_0 = arith.constant 0 : index
    %0 = vector.load %arg1[%c0, %c0_0] : memref<8x3xf32, #tpu.memory_space<vmem>>, vector<8x3xf32>
    %c0_1 = arith.constant 0 : index
    %c0_2 = arith.constant 0 : index
    %1 = vector.load %arg2[%c0_1, %c0_2] : memref<3x64xf32, #tpu.memory_space<vmem>>, vector<3x64xf32>
    %c0_3 = arith.constant 0 : index
    %c0_4 = arith.constant 0 : index
    %2 = vector.load %arg3[%c0_3, %c0_4] : memref<1x64xf32, #tpu.memory_space<vmem>>, vector<1x64xf32>
    %3 = vector.extract_strided_slice %0 {offsets = [0, 0], sizes = [8, 1], strides = [1, 1]} : vector<8x3xf32> to vector<8x1xf32>
    %4 = vector.extract_strided_slice %1 {offsets = [0, 0], sizes = [1, 64], strides = [1, 1]} : vector<3x64xf32> to vector<1x64xf32>
    %5 = vector.broadcast %3 : vector<8x1xf32> to vector<8x64xf32>
    %6 = vector.broadcast %4 : vector<1x64xf32> to vector<8x64xf32>
    %7 = arith.mulf %5, %6 : vector<8x64xf32>
    %8 = vector.broadcast %2 : vector<1x64xf32> to vector<8x64xf32>
    %9 = arith.addf %8, %7 : vector<8x64xf32>
    %10 = vector.extract_strided_slice %0 {offsets = [0, 1], sizes = [8, 1], strides = [1, 1]} : vector<8x3xf32> to vector<8x1xf32>
    %11 = vector.extract_strided_slice %1 {offsets = [1, 0], sizes = [1, 64], strides = [1, 1]} : vector<3x64xf32> to vector<1x64xf32>
    %12 = vector.broadcast %10 : vector<8x1xf32> to vector<8x64xf32>
    %13 = vector.broadcast %11 : vector<1x64xf32> to vector<8x64xf32>
    %14 = arith.mulf %12, %13 : vector<8x64xf32>
    %15 = arith.addf %9, %14 : vector<8x64xf32>
    %16 = vector.extract_strided_slice %0 {offsets = [0, 2], sizes = [8, 1], strides = [1, 1]} : vector<8x3xf32> to vector<8x1xf32>
    %17 = vector.extract_strided_slice %1 {offsets = [2, 0], sizes = [1, 64], strides = [1, 1]} : vector<3x64xf32> to vector<1x64xf32>
    %18 = vector.broadcast %16 : vector<8x1xf32> to vector<8x64xf32>
    %19 = vector.broadcast %17 : vector<1x64xf32> to vector<8x64xf32>
    %20 = arith.mulf %18, %19 : vector<8x64xf32>
    %21 = arith.addf %15, %20 : vector<8x64xf32>
    %cst = arith.constant 0.000000e+00 : f32
    %22 = vector.broadcast %cst : f32 to vector<8x64xf32>
    %23 = arith.maximumf %21, %22 : vector<8x64xf32>
    %c0_5 = arith.constant 0 : index
    %c0_6 = arith.constant 0 : index
    %24 = vector.load %arg4[%c0_5, %c0_6] : memref<64x64xf32, #tpu.memory_space<vmem>>, vector<64x64xf32>
    %cst_7 = arith.constant dense<0.000000e+00> : vector<8x64xf32>
    %25 = tpu.matmul %23, %24, %cst_7 {dimension_numbers = #tpu.dot_dimension_numbers<[1], [0], [0], [1], [0, 0, 1, 1], [], []>} : vector<8x64xf32>, vector<64x64xf32>, vector<8x64xf32> -> vector<8x64xf32>
    %c0_8 = arith.constant 0 : index
    %c0_9 = arith.constant 0 : index
    %26 = vector.load %arg5[%c0_8, %c0_9] : memref<1x64xf32, #tpu.memory_space<vmem>>, vector<1x64xf32>
    %27 = vector.broadcast %26 : vector<1x64xf32> to vector<8x64xf32>
    %28 = arith.addf %25, %27 : vector<8x64xf32>
    %cst_10 = arith.constant 0.000000e+00 : f32
    %29 = vector.broadcast %cst_10 : f32 to vector<8x64xf32>
    %30 = arith.maximumf %28, %29 : vector<8x64xf32>
    %c0_11 = arith.constant 0 : index
    %c0_12 = arith.constant 0 : index
    %31 = vector.load %arg6[%c0_11, %c0_12] : memref<64x4xf32, #tpu.memory_space<vmem>>, vector<64x4xf32>
    %cst_13 = arith.constant dense<0.000000e+00> : vector<8x4xf32>
    %32 = tpu.matmul %30, %31, %cst_13 {dimension_numbers = #tpu.dot_dimension_numbers<[1], [0], [0], [1], [0, 0, 1, 1], [], []>} : vector<8x64xf32>, vector<64x4xf32>, vector<8x4xf32> -> vector<8x4xf32>
    %c0_14 = arith.constant 0 : index
    %c0_15 = arith.constant 0 : index
    %33 = vector.load %arg7[%c0_14, %c0_15] : memref<1x4xf32, #tpu.memory_space<vmem>>, vector<1x4xf32>
    %34 = vector.broadcast %33 : vector<1x4xf32> to vector<8x4xf32>
    %35 = arith.addf %32, %34 : vector<8x4xf32>
    %c0_16 = arith.constant 0 : index
    %c0_17 = arith.constant 0 : index
    %36 = vector.load %arg8[%c0_16, %c0_17] : memref<8x4xf32, #tpu.memory_space<vmem>>, vector<8x4xf32>
    tpu.vector_store %arg8[%c0_16, %c0_17], %35 {strides = array<i32>} : memref<8x4xf32, #tpu.memory_space<vmem>>, vector<8x4xf32>,
    return
  }
  func.func @transform_0(%arg0: i32) -> (i32, i32) {
    %c0_i32 = arith.constant 0 : i32
    %c0_i32_0 = arith.constant 0 : i32
    return %arg0, %c0_i32 : i32, i32
  }
  func.func @transform_1(%arg0: i32) -> (i32, i32) {
    %c0_i32 = arith.constant 0 : i32
    %c0_i32_0 = arith.constant 0 : i32
    %c0_i32_1 = arith.constant 0 : i32
    return %c0_i32, %c0_i32_0 : i32, i32
  }
  func.func @transform_2(%arg0: i32) -> (i32, i32) {
    %c0_i32 = arith.constant 0 : i32
    %c0_i32_0 = arith.constant 0 : i32
    %c0_i32_1 = arith.constant 0 : i32
    return %c0_i32, %c0_i32_0 : i32, i32
  }
  func.func @transform_3(%arg0: i32) -> (i32, i32) {
    %c0_i32 = arith.constant 0 : i32
    %c0_i32_0 = arith.constant 0 : i32
    %c0_i32_1 = arith.constant 0 : i32
    return %c0_i32, %c0_i32_0 : i32, i32
  }
  func.func @transform_4(%arg0: i32) -> (i32, i32) {
    %c0_i32 = arith.constant 0 : i32
    %c0_i32_0 = arith.constant 0 : i32
    %c0_i32_1 = arith.constant 0 : i32
    return %c0_i32, %c0_i32_0 : i32, i32
  }
  func.func @transform_5(%arg0: i32) -> (i32, i32) {
    %c0_i32 = arith.constant 0 : i32
    %c0_i32_0 = arith.constant 0 : i32
    %c0_i32_1 = arith.constant 0 : i32
    return %c0_i32, %c0_i32_0 : i32, i32
  }
  func.func @transform_6(%arg0: i32) -> (i32, i32) {
    %c0_i32 = arith.constant 0 : i32
    %c0_i32_0 = arith.constant 0 : i32
    %c0_i32_1 = arith.constant 0 : i32
    return %c0_i32, %c0_i32_0 : i32, i32
  }
  func.func @transform_7(%arg0: i32) -> (i32, i32) {
    %c0_i32 = arith.constant 0 : i32
    %c0_i32_0 = arith.constant 0 : i32
    return %arg0, %c0_i32 : i32, i32
  }
}

</mosaic_0001>

<bundles_post_ra>
// kernel: tpu_custom_call.1
= control target key start
LH: loop header
LB: loop body
LE: loop exit
PB: predicated region body
PF: predicated region fallthrough
CT: control target
= control target key end

     0   :  { %v321_v0 = vmov 0   ;;  %v322_v2 = vmov 2   ;;  %v323_v4 = vmov 0.0   ;;  %v324_v7 = vmov 1   ;;  %s452_s0 = inlined_call_operand.vmem [shape: f32[8,3], index: 0, kind: input, shape index: {}]   ;;  %s453_s3 = inlined_call_operand.vmem [shape: f32[64,64], index: 3, kind: input, shape index: {}]   ;;  %s454_s5 = inlined_call_operand.vmem [shape: f32[64,4], index: 5, kind: input, shape index: {}]   ;;  %s455_s1 = inlined_call_operand.vmem [shape: f32[3,64], index: 1, kind: input, shape index: {}]   ;;  %s456_s2 = inlined_call_operand.vmem [shape: f32[1,64], index: 2, kind: input, shape index: {}]   ;;  %s457_s4 = inlined_call_operand.vmem [shape: f32[1,64], index: 4, kind: input, shape index: {}]   ;;  %s458_s6 = inlined_call_operand.vmem [shape: f32[1,4], index: 6, kind: input, shape index: {}]   ;;  %s459_s7 = inlined_call_operand.vmem [shape: f32[8,4], index: 7, kind: output, shape index: {}]  }
   0x1   :  { %317 = vset.pattern.permute.xlu0 %v321_v0  ;;  %v26_v1 = vld [vmem:[%s452_s0] sm:$0xff]  ;;  %319 = vset.pattern.permute.xlu1 %v322_v2  ;;  %v74_v3 = vld [vmem:[%s453_s3 + $0x38] sm:$0xff]  ;;  %v73_v5 = vld [vmem:[%s453_s3 + $0x30] sm:$0xff]  ;;  %vm325_vm0 = vmmov 0   ;;  %v34_v18 = vlaneseq  ;;  %vm82_vm1 = vcmask 523264   ;;  %vm245_vm2 = vcmask 31744  }
   0x2   :  { %31 = vperm.xlu0 %317, %v26_v1   ;;  %57 = vperm.xlu1 %319, %v26_v1   ;;  %v72_v6 = vld [vmem:[%s453_s3 + $0x28] sm:$0xff]  ;;  %v71_v8 = vld [vmem:[%s453_s3 + $0x20] sm:$0xff]  ;;  %v70_v9 = vld [vmem:[%s453_s3 + $0x18] sm:$0xff] }
   0x3   :  { %274 = vmatprep.subr.mxu0 %v323_v4  ;;  %293 = vmatprep.subr.mxu1 %v323_v4  ;;  %v69_v10 = vld [vmem:[%s453_s3 + $0x10] sm:$0xff]  ;;  %v164_v11 = vld [vmem:[%s454_s5 + $0x38] sm:$0xff]  ;;  %v68_v13 = vld [vmem:[%s453_s3 + $0x8] sm:$0xff]  ;;  %v35_v19 = vshrl.u32 %v34_v18, 7 }
   0x4   :  { %275 = vmatpush3.msra.mxu0 %v74_v3  ;;  %290 = vmatprep.mubr.msk.f32.mxu0 %vm325_vm0, %v323_v4  ;;  %v163_v12 = vld [vmem:[%s454_s5 + $0x30] sm:$0xff]  ;;  %v162_v14 = vld [vmem:[%s454_s5 + $0x28] sm:$0xff]  ;;  %v67_v15 = vld [vmem:[%s453_s3] sm:$0xff] }
   0x5   :  { %276 = vmatprep.subr.mxu0 %v323_v4  ;;  %309 = vmatprep.mubr.msk.f32.mxu1 %vm325_vm0, %v323_v4  ;;  %v161_v16 = vld [vmem:[%s454_s5 + $0x20] sm:$0xff]  ;;  %v160_v17 = vld [vmem:[%s454_s5 + $0x18] sm:$0xff]  ;;  %v36_v20 = vsub.s32 0, %v35_v19  ;;  %v52_v23 = vsub.s32 1, %v35_v19  ;;  %v62_v24 = vsub.s32 2, %v35_v19  ;;  %v159_v38 = vld [vmem:[%s454_s5 + $0x10] sm:$0xff] }
   0x6   :  { %318 = vset.pattern.permute.xlu0 %v324_v7  ;;  %277 = vmatpush3.msra.mxu0 %v73_v5  ;;  %v27_v21 = vld [vmem:[%s455_s1] sm:$0x7]  ;;  %v158_v39 = vld [vmem:[%s454_s5 + $0x8] sm:$0xff] }
   0x7   :  { %47 = vperm.xlu0 %318, %v26_v1   ;;  %278 = vmatprep.subr.mxu0 %v323_v4  ;;  %v37_v22 = vrot.slane %v27_v21, %v36_v20  ;;  %v53_v27 = vrot.slane %v27_v21, %v52_v23  ;;  %v63_v28 = vrot.slane %v27_v21, %v62_v24  ;;  %v251_v29 = vld [vmem:[%s456_s2] ss:$0 sm:$0xff] }
   0x8   :  { %279 = vmatpush3.msra.mxu0 %v72_v6  ;;  %294 = vmatpush3.msra.mxu1 %v164_v11  ;;  %v157_v40 = vld [vmem:[%s454_s5] sm:$0xff] }
   0x9   :  { %280 = vmatprep.subr.mxu0 %v323_v4  ;;  %295 = vmatprep.subr.mxu1 %v323_v4  ;;  %v252_v41 = vld [vmem:[%s457_s4] ss:$0 sm:$0xff] }
   0xa   :  { %281 = vmatpush3.msra.mxu0 %v71_v8  ;;  %296 = vmatpush3.msra.mxu1 %v163_v12  ;;  %v254_v46 = vld [vmem:[%s458_s6] ss:$0 sm:$0xff] }
   0xb   :  { %282 = vmatprep.subr.mxu0 %v323_v4  ;;  %320 = vset.pattern.permute.xlu0 %v322_v2 }
   0xc   :  { %283 = vmatpush3.msra.mxu0 %v70_v9  ;;  %297 = vmatprep.subr.mxu1 %v323_v4 }
   0xd   :  { %284 = vmatprep.subr.mxu0 %v323_v4  ;;  %298 = vmatpush3.msra.mxu1 %v162_v14 }
   0xe   :  { %285 = vmatpush3.msra.mxu0 %v69_v10  ;;  %299 = vmatprep.subr.mxu1 %v323_v4 }
   0xf   :  { %286 = vmatprep.subr.mxu0 %v323_v4  ;;  %300 = vmatpush3.msra.mxu1 %v161_v16 }
  0x10   :  { %287 = vmatpush3.msra.mxu0 %v68_v13  ;;  %301 = vmatprep.subr.mxu1 %v323_v4 }
  0x11   :  { %288 = vmatprep.subr.mxu0 %v323_v4  ;;  %302 = vmatpush3.msra.mxu1 %v160_v17 }
  0x12   :  { %289 = vmatpush3.msra.mxu0 %v67_v15  ;;  %303 = vmatprep.subr.mxu1 %v323_v4 }
  0x13   :  { %304 = vmatpush3.msra.mxu1 %v159_v38 }
  0x14   :  { %305 = vmatprep.subr.mxu1 %v323_v4 }
  0x15   :  { %306 = vmatpush3.msra.mxu1 %v158_v39 }
  0x16   :  { %307 = vmatprep.subr.mxu1 %v323_v4 }
  0x17   :  { %308 = vmatpush3.msra.mxu1 %v157_v40 }
  0x7d   :  { %v32_v25 = vpop.permute.xlu0 %31  ;;  %v58_v30 = vpop.permute.xlu1 %57 }
  0x7e   :  { %v38_v26 = vmul.f32 %v37_v22, %v32_v25  ;;  %v64_v34 = vmul.f32 %v63_v28, %v58_v30 }
  0x80   :  { %v45_v32 = vadd.f32 %v251_v29, %v38_v26 }
  0x82   :  { %v48_v31 = vpop.permute.xlu0 %47 }
  0x83   :  { %v54_v33 = vmul.f32 %v53_v27, %v48_v31 }
  0x85   :  { %v55_v35 = vadd.f32 %v54_v33, %v45_v32 }
  0x87   :  { %v65_v36 = vadd.f32 %v64_v34, %v55_v35 }
  0x89   :  { %v66_v37 = vmax.f32 %v65_v36, 0.0 }
  0x8b   :  { %291 = vmatmul.mubr.msk.f32.vlgmr.msra.gmra.mxu0 %vm82_vm1, %v66_v37 }
 0x14b   :  { %v152_v42 = vpop.f32.mrf.mxu0 }
 0x14c   :  { %v153_v43 = vadd.f32 %v252_v41, %v152_v42 }
 0x14d   :  { %v292_v44 = vpop.f32.mrf.mxu0 }
 0x14e   :  { %v156_v45 = vmax.f32 %v153_v43, 0.0 }
 0x150   :  { %310 = vmatmul.mubr.msk.f32.vlgmr.msra.gmra.mxu1 %vm82_vm1, %v156_v45 }
 0x210   :  { %v241_v47 = vpop.f32.mrf.mxu1 }
 0x211   :  { %v242_v48 = vadd.f32 %v254_v46, %v241_v47 }
 0x212   :  { %v311_v49 = vpop.f32.mrf.mxu1 }
 0x213   :  { %246 = vst.msk [vmem:[%s459_s7] sm:$0xff] %vm245_vm2, %v242_v48 }

</bundles_post_ra>
